<compile_context>
chip_gen: v5e
topology: v5e:2x2
jax: 0.10.0
libtpu: 0.0.40
codegen_flags: <defaults>
</compile_context>

<pallas_src>
import jax
import jax.numpy as jnp
from jax.experimental import pallas as pl
from jax.experimental.pallas import tpu as pltpu


# ----------------------------- helpers ------------------------------------- #

def _round_up(n, m):
    return ((n + m - 1) // m) * m


def _pad_to(arr, axis, target):
    pad = target - arr.shape[axis]
    if pad <= 0:
        return arr
    widths = [(0, 0)] * arr.ndim
    widths[axis] = (0, pad)
    return jnp.pad(arr, widths)


# ----------------------------- kernels ------------------------------------- #

def _mlp(x, w1, b1, w2, b2, out_dtype):
    # Two MXU matmuls (f32 accumulation) + bias adds + tanh (EUP), all in VMEM.
    h1 = jnp.tanh(jnp.dot(x, w1, preferred_element_type=jnp.float32) + b1)
    h2 = jnp.tanh(jnp.dot(h1, w2, preferred_element_type=jnp.float32) + b2)
    return h2.astype(out_dtype)


def _actor_single_kernel(x_ref, w1_ref, b1_ref, w2_ref, b2_ref, o_ref):
    # Grid-less: refs are the full (tiny) arrays, already in VMEM.
    o_ref[...] = _mlp(x_ref[...], w1_ref[...], b1_ref[...],
                      w2_ref[...], b2_ref[...], o_ref.dtype)


def _actor_block_kernel(x_ref, w1_ref, b1_ref, w2_ref, b2_ref, o_ref):
    # Blocked: leading particle dim of every block is 1; index it away.
    o_ref[0] = _mlp(x_ref[0], w1_ref[0], b1_ref[0],
                    w2_ref[0], b2_ref[0], o_ref.dtype)


# ----------------------------- wrappers ------------------------------------ #

def svpg_particle_actor_forward(x, w1, b1, w2, b2):
    """One SVPGParticleActor forward (matches the PyTorch module exactly).

    x: (B, in_size); w1: (in_size, h); b1: (1, h); w2: (h, h); b2: (1, h).
    Grid-less pallas_call: the whole problem is a few KiB, so we skip the grid
    machinery entirely and keep everything VMEM-resident. Hidden dim is padded
    to 128 lanes (zeros) for unmasked stores / full lane occupancy, then sliced.
    """
    B, in_size = x.shape
    h = w1.shape[1]
    hp = _round_up(h, 128)

    w1p = _pad_to(w1, 1, hp)
    b1p = _pad_to(b1, 1, hp)
    w2p = _pad_to(_pad_to(w2, 1, hp), 0, hp)
    b2p = _pad_to(b2, 1, hp)

    cost = pl.CostEstimate(
        flops=2 * B * (in_size * hp + hp * hp),
        transcendentals=2 * B * hp,
        bytes_accessed=4 * (x.size + w1p.size + b1p.size + w2p.size
                            + b2p.size + B * hp),
    )

    vmem_spec = pl.BlockSpec(memory_space=pltpu.MemorySpace.VMEM)
    out_padded = pl.pallas_call(
        _actor_single_kernel,
        out_shape=jax.ShapeDtypeStruct((B, hp), x.dtype),
        in_specs=[vmem_spec] * 5,
        out_specs=vmem_spec,
        cost_estimate=cost,
    )(x, w1p, b1p, w2p, b2p)
    return out_padded[:, :h]


def svpg_stacked_actor_forward(x, w1, b1, w2, b2, *, block_b=512):
    """P independent SVPG particle actors fused into one pipelined kernel.

    x: (P, B, in_size); w1: (P, in_size, h); b1: (P, 1, h);
    w2: (P, h, h);      b2: (P, 1, h).  Returns (P, B, h).

    grid = (P, batch_tiles). Weight/bias blocks have a constant index over the
    batch axis, so they stay VMEM-resident while x/out blocks walk the batch.
    Both axes are "parallel" (independent work) -> v7x megacore sharding.
    """
    P, B, in_size = x.shape
    h = w1.shape[-1]
    hp = _round_up(h, 128)

    if B <= block_b:
        tb, Bp = B, B                       # full-extent batch block
    else:
        tb = max(8, (block_b // 8) * 8)      # sublane-aligned batch tile
        Bp = _round_up(B, tb)

    xp = _pad_to(x, 1, Bp)
    w1p = _pad_to(w1, 2, hp)
    b1p = _pad_to(b1, 2, hp)
    w2p = _pad_to(_pad_to(w2, 2, hp), 1, hp)
    b2p = _pad_to(b2, 2, hp)
    nb = Bp // tb

    cost = pl.CostEstimate(
        flops=2 * P * Bp * (in_size * hp + hp * hp),
        transcendentals=2 * P * Bp * hp,
        bytes_accessed=4 * (xp.size + w1p.size + b1p.size + w2p.size
                            + b2p.size + P * Bp * hp),
    )

    out_padded = pl.pallas_call(
        _actor_block_kernel,
        out_shape=jax.ShapeDtypeStruct((P, Bp, hp), x.dtype),
        grid=(P, nb),
        in_specs=[
            pl.BlockSpec((1, tb, in_size), lambda p, b: (p, b, 0)),   # x
            pl.BlockSpec((1, in_size, hp), lambda p, b: (p, 0, 0)),   # w1
            pl.BlockSpec((1, 1, hp),       lambda p, b: (p, 0, 0)),   # b1
            pl.BlockSpec((1, hp, hp),      lambda p, b: (p, 0, 0)),   # w2
            pl.BlockSpec((1, 1, hp),       lambda p, b: (p, 0, 0)),   # b2
        ],
        out_specs=pl.BlockSpec((1, tb, hp), lambda p, b: (p, b, 0)),
        compiler_params=pltpu.CompilerParams(
            dimension_semantics=("parallel", "parallel"),
        ),
        cost_estimate=cost,
    )(xp, w1p, b1p, w2p, b2p)
    return out_padded[:, :B, :h]


# ----------------------------- reference ----------------------------------- #

def reference_forward(x, w1, b1, w2, b2):
    h1 = jnp.tanh(x @ w1 + b1)
    return jnp.tanh(h1 @ w2 + b2)


# ----------------------------- main ---------------------------------------- #

if __name__ == "__main__":
    B, in_size, hidden, P = 8, 4, 32, 4

    key = jax.random.PRNGKey(0)
    kx, k1, kb1, k2, kb2, kxs, kw1s, kb1s, kw2s, kb2s = jax.random.split(key, 10)

    # --- single-actor path (exact module semantics) ---
    x = jax.random.normal(kx, (B, in_size), dtype=jnp.float32)
    w1 = jax.random.normal(k1, (in_size, hidden), dtype=jnp.float32) * 0.1
    b1 = jax.random.normal(kb1, (1, hidden), dtype=jnp.float32) * 0.1
    w2 = jax.random.normal(k2, (hidden, hidden), dtype=jnp.float32) * 0.1
    b2 = jax.random.normal(kb2, (1, hidden), dtype=jnp.float32) * 0.1

    out = jax.block_until_ready(svpg_particle_actor_forward(x, w1, b1, w2, b2))
    ref = reference_forward(x, w1, b1, w2, b2)
    assert out.shape == (B, hidden)
    assert jnp.allclose(out, ref, atol=1e-5, rtol=1e-5), "single-actor mismatch"

    # --- stacked multi-particle path ---
    xs = jax.random.normal(kxs, (P, B, in_size), dtype=jnp.float32)
    w1s = jax.random.normal(kw1s, (P, in_size, hidden), dtype=jnp.float32) * 0.1
    b1s = jax.random.normal(kb1s, (P, 1, hidden), dtype=jnp.float32) * 0.1
    w2s = jax.random.normal(kw2s, (P, hidden, hidden), dtype=jnp.float32) * 0.1
    b2s = jax.random.normal(kb2s, (P, 1, hidden), dtype=jnp.float32) * 0.1

    outs = jax.block_until_ready(
        svpg_stacked_actor_forward(xs, w1s, b1s, w2s, b2s))
    refs = jax.vmap(reference_forward)(xs, w1s, b1s, w2s, b2s)
    assert outs.shape == (P, B, hidden)
    assert jnp.allclose(outs, refs, atol=1e-5, rtol=1e-5), "stacked mismatch"

    print("KERNEL_OK")
</pallas_src>

<mosaic_0001>
module attributes {stable_mosaic.version = 11 : i64} {
  func.func @_actor_single_kernel(%arg0: memref<8x4xf32, #tpu.memory_space<vmem>>, %arg1: memref<4x128xf32, #tpu.memory_space<vmem>>, %arg2: memref<1x128xf32, #tpu.memory_space<vmem>>, %arg3: memref<128x128xf32, #tpu.memory_space<vmem>>, %arg4: memref<1x128xf32, #tpu.memory_space<vmem>>, %arg5: memref<8x128xf32, #tpu.memory_space<vmem>>) attributes {dimension_semantics = [], scalar_prefetch = 0 : i64, scratch_operands = 0 : i64, tpu.core_type = #tpu.core_type<tc>} {
    %c0 = arith.constant 0 : index
    %c0_0 = arith.constant 0 : index
    %0 = vector.load %arg0[%c0, %c0_0] : memref<8x4xf32, #tpu.memory_space<vmem>>, vector<8x4xf32>
    %c0_1 = arith.constant 0 : index
    %c0_2 = arith.constant 0 : index
    %1 = vector.load %arg1[%c0_1, %c0_2] : memref<4x128xf32, #tpu.memory_space<vmem>>, vector<4x128xf32>
    %c0_3 = arith.constant 0 : index
    %c0_4 = arith.constant 0 : index
    %2 = vector.load %arg2[%c0_3, %c0_4] : memref<1x128xf32, #tpu.memory_space<vmem>>, vector<1x128xf32>
    %c0_5 = arith.constant 0 : index
    %c0_6 = arith.constant 0 : index
    %3 = vector.load %arg3[%c0_5, %c0_6] : memref<128x128xf32, #tpu.memory_space<vmem>>, vector<128x128xf32>
    %c0_7 = arith.constant 0 : index
    %c0_8 = arith.constant 0 : index
    %4 = vector.load %arg4[%c0_7, %c0_8] : memref<1x128xf32, #tpu.memory_space<vmem>>, vector<1x128xf32>
    %cst = arith.constant dense<0.000000e+00> : vector<8x128xf32>
    %5 = tpu.matmul %0, %1, %cst {dimension_numbers = #tpu.dot_dimension_numbers<[1], [0], [0], [1], [0, 0, 1, 1], [], []>} : vector<8x4xf32>, vector<4x128xf32>, vector<8x128xf32> -> vector<8x128xf32>
    %6 = vector.broadcast %2 : vector<1x128xf32> to vector<8x128xf32>
    %7 = arith.addf %5, %6 : vector<8x128xf32>
    %8 = math.tanh %7 : vector<8x128xf32>
    %cst_9 = arith.constant dense<0.000000e+00> : vector<8x128xf32>
    %9 = tpu.matmul %8, %3, %cst_9 {dimension_numbers = #tpu.dot_dimension_numbers<[1], [0], [0], [1], [0, 0, 1, 1], [], []>} : vector<8x128xf32>, vector<128x128xf32>, vector<8x128xf32> -> vector<8x128xf32>
    %10 = vector.broadcast %4 : vector<1x128xf32> to vector<8x128xf32>
    %11 = arith.addf %9, %10 : vector<8x128xf32>
    %12 = math.tanh %11 : vector<8x128xf32>
    %c0_10 = arith.constant 0 : index
    %c0_11 = arith.constant 0 : index
    %13 = vector.load %arg5[%c0_10, %c0_11] : memref<8x128xf32, #tpu.memory_space<vmem>>, vector<8x128xf32>
    tpu.vector_store %arg5[%c0_10, %c0_11], %12 {strides = array<i32>} : memref<8x128xf32, #tpu.memory_space<vmem>>, vector<8x128xf32>,
    return
  }
}

</mosaic_0001>

<bundles_post_ra>
// kernel: tpu_custom_call.1
= control target key start
LH: loop header
LB: loop body
LE: loop exit
PB: predicated region body
PF: predicated region fallthrough
CT: control target
= control target key end

     0   :  { %10 = vsyncpa [#allocation3], 0  ;;  %s247_s0 = inlined_call_operand.vmem [shape: f32[8,4], index: 0, kind: input, shape index: {}]   ;;  %s248_s1 = inlined_call_operand.vmem [shape: f32[4,128], index: 1, kind: input, shape index: {}]   ;;  %s249_s2 = inlined_call_operand.vmem [shape: f32[1,128], index: 2, kind: input, shape index: {}]   ;;  %s250_s3 = inlined_call_operand.hbm [shape: f32[128,128], index: 3, kind: input, shape index: {}]   ;;  %s251_s4 = inlined_call_operand.vmem [shape: f32[1,128], index: 4, kind: input, shape index: {}]   ;;  %s252_s5 = inlined_call_operand.hbm [shape: f32[8,128], index: 5, kind: output, shape index: {}]  }
   0x1   :  { %11 = vsyncpa [#allocation4], 0  ;;  %s22_s20 = sshll.u32 %s250_s3, 4  ;;  %s195_s21 = smov [#allocation2]   ;;  %s23_s20 = int_to_ptr.hbm [resolvable:$true] %s22_s20 }
   0x2   :  { %s24_s22 = sshll.u32 %s195_s21, 4  ;;  %s196_s23 = smov 128   ;;  %s25_s22 = int_to_ptr.vmem [resolvable:$true] %s24_s22 }
   0x3   :  { %s197_s24 = smov 8  }
   0x4   :  { %30 = dma.hbm_to_vmem [thread:$0]  %s23_s20, 2048, %s25_s22, [#allocation3], %s196_s23, %s196_s23, %s197_s24  }
   0x5   :  { %191 = dma.done.wait [#allocation3], 2048  }
   0x6   :  { %192 = vsyncadd [#allocation3], 4294965248  ;;  %vm64_vm0 = vcmask 1043456   ;;  %vm60_vm1 = vcmask 31744   ;;  %v38_v0 = vld [vmem:[%s248_s1] sm:$0xf] }
   0x7   :  { %v37_v1 = vld [vmem:[%s247_s0] sm:$0xff]  ;;  %v55_v2 = vld [vmem:[#allocation2 + $0x78] sm:$0xff]  ;;  %131 = vmatpush.msk.msra.mxu0 %vm64_vm0, %v38_v0  ;;  %v54_v3 = vld [vmem:[#allocation2 + $0x70] sm:$0xff]  ;;  %s198_s30 = smov [#allocation5]   ;;  %s121_s9 = sshll.u32 %s252_s5, 4  ;;  %s122_s9 = int_to_ptr.hbm [resolvable:$true] %s121_s9 }
   0x8   :  { %92 = vmatpush.msra.mxu1 %v55_v2  ;;  %132 = vmatmul.msk.f32.vlgmr.msra.gmra.mxu0 %vm60_vm1, %v37_v1  ;;  %v53_v4 = vld [vmem:[#allocation2 + $0x68] sm:$0xff]  ;;  %v52_v5 = vld [vmem:[#allocation2 + $0x60] sm:$0xff]  ;;  %v51_v6 = vld [vmem:[#allocation2 + $0x58] sm:$0xff]  ;;  %s119_s6 = sshll.u32 %s198_s30, 4  ;;  %s120_s6 = int_to_ptr.vmem [resolvable:$true] %s119_s6 }
   0x9   :  { %v50_v7 = vld [vmem:[#allocation2 + $0x50] sm:$0xff]  ;;  %v49_v8 = vld [vmem:[#allocation2 + $0x48] sm:$0xff]  ;;  %v48_v9 = vld [vmem:[#allocation2 + $0x40] sm:$0xff] }
   0xa   :  { %93 = vmatpush.msra.mxu1 %v54_v3  ;;  %v47_v10 = vld [vmem:[#allocation2 + $0x38] sm:$0xff]  ;;  %v46_v11 = vld [vmem:[#allocation2 + $0x30] sm:$0xff]  ;;  %v45_v12 = vld [vmem:[#allocation2 + $0x28] sm:$0xff] }
   0xb   :  { %v44_v13 = vld [vmem:[#allocation2 + $0x20] sm:$0xff]  ;;  %v43_v14 = vld [vmem:[#allocation2 + $0x18] sm:$0xff]  ;;  %v42_v15 = vld [vmem:[#allocation2 + $0x10] sm:$0xff] }
   0xc   :  { %94 = vmatpush.msra.mxu1 %v53_v4  ;;  %v41_v16 = vld [vmem:[#allocation2 + $0x8] sm:$0xff]  ;;  %v40_v17 = vld [vmem:[#allocation2] sm:$0xff] }
   0xd   :  { %v137_v18 = vld [vmem:[%s249_s2] ss:$0 sm:$0xff] }
   0xe   :  { %95 = vmatpush.msra.mxu1 %v52_v5  ;;  %v138_v22 = vld [vmem:[%s251_s4] ss:$0 sm:$0xff] }
  0x10   :  { %96 = vmatpush.msra.mxu1 %v51_v6 }
  0x12   :  { %97 = vmatpush.msra.mxu1 %v50_v7 }
  0x14   :  { %98 = vmatpush.msra.mxu1 %v49_v8 }
  0x16   :  { %99 = vmatpush.msra.mxu1 %v48_v9 }
  0x18   :  { %100 = vmatpush.msra.mxu1 %v47_v10 }
  0x1a   :  { %101 = vmatpush.msra.mxu1 %v46_v11 }
  0x1c   :  { %102 = vmatpush.msra.mxu1 %v45_v12 }
  0x1e   :  { %103 = vmatpush.msra.mxu1 %v44_v13 }
  0x20   :  { %104 = vmatpush.msra.mxu1 %v43_v14 }
  0x22   :  { %105 = vmatpush.msra.mxu1 %v42_v15 }
  0x24   :  { %106 = vmatpush.msra.mxu1 %v41_v16 }
  0x26   :  { %107 = vmatpush.msra.mxu1 %v40_v17 }
  0x85   :  { %v85_v19 = vpop.f32.mrf.mxu0 }
  0x86   :  { %v86_v20 = vadd.f32 %v137_v18, %v85_v19 }
  0x88   :  { %139 = vtanh.f32 %v86_v20 }
  0x8e   :  { %v140_v21 = vpop.eup %139 }
  0x8f   :  { %108 = vmatmul.f32.vlgmr.msra.gmra.mxu1 %v140_v21 }
 0x10c   :  { %v109_v23 = vpop.f32.mrf.mxu1 }
 0x10d   :  { %v110_v24 = vadd.f32 %v138_v22, %v109_v23 }
 0x10f   :  { %141 = vtanh.f32 %v110_v24 }
 0x115   :  { %v142_v25 = vpop.eup %141 }
 0x116   :  { %113 = vst [vmem:[#allocation5] sm:$0xff] %v142_v25 }
 0x117   :  { %124 = dma.vmem_to_hbm [thread:$0]  %s120_s6, 128, %s122_s9, [#allocation4]  }
 0x118   :  { %193 = dma.done.wait [#allocation4], 128  }
 0x119   :  { %194 = vsyncadd [#allocation4], 4294967168 }
 0x11a   :  { %129 = vsyncpa [#allocation3], 1 }
 0x11b   :  { %130 = vsyncpa [#allocation4], 1 }

</bundles_post_ra>
